<compile_context>
chip_gen: v7x
topology: tpu7x:2x2x1
jax: 0.10.0
libtpu: 0.0.40
codegen_flags: <defaults>
</compile_context>

<pallas_src>
import functools

import jax
import jax.numpy as jnp
from jax.experimental import pallas as pl
from jax.experimental.pallas import tpu as pltpu

LANE = 128


# --------------------------------------------------------------------------- #
# Kernel
# --------------------------------------------------------------------------- #
def _router_gate_kernel(x_ref, w_ref, b_ref,
                        scores_ref, combine_ref, idx_ref, topk_ref,
                        acc_ref, *, num_experts, top_k, inv_seq_len):
    """One (B-tile, S-tile) grid step.

    x_ref:       [tile_b, tile_s, D]  token tile (any float dtype)
    w_ref:       [D, E_pad]           l3 weight (pre-transposed, lane-padded)
    b_ref:       [1, E_pad]           l3 bias   (lane-padded)
    scores_ref:  [tile_b, E_pad]      expert scores (padded lanes = -inf)
    combine_ref: [tile_b, E_pad]      combine tensor (top-k probs scattered)
    idx_ref:     [tile_b, top_k]      top-k expert indices (int32)
    topk_ref:    [tile_b, top_k]      top-k gate scores
    acc_ref:     [tile_b, D] VMEM     running pooled sum over S (f32)
    """
    s = pl.program_id(1)

    @pl.when(s == 0)
    def _():
        acc_ref[...] = jnp.zeros_like(acc_ref)

    # Streaming pooled sum over the sequence tile (XLU cross-sublane reduce,
    # hidden under the DMA-bound x streaming).
    # TODO(synk): optional v7x micro-opt — keep a (tile_b, 8, D) partial-sum
    # scratch and collapse sublanes once in the finalize block if a bundle dump
    # shows XLU/store pressure at 3.2 TB/s.
    acc_ref[...] += jnp.sum(x_ref[...].astype(jnp.float32), axis=1)

    @pl.when(s == pl.num_programs(1) - 1)
    def _():
        pooled = acc_ref[...] * inv_seq_len                         # [tile_b, D]
        w = w_ref[...].astype(jnp.float32)
        b = b_ref[...].astype(jnp.float32)
        # Single tiny GEMM on the MXU: mean(x) @ W + b  (== mean(xW) + b).
        scores = jnp.dot(pooled, w, preferred_element_type=jnp.float32) + b

        e_pad = scores.shape[-1]
        tile_b = scores.shape[0]
        lane_ids = jax.lax.broadcasted_iota(jnp.int32, scores.shape, 1)
        valid = lane_ids < num_experts
        scores = jnp.where(valid, scores, -jnp.inf)

        # Softmax over experts; divide goes to the otherwise-idle EUP slot.
        m = jnp.max(scores, axis=-1, keepdims=True)
        e = jnp.where(valid, jnp.exp(scores - m), 0.0)
        denom = jnp.sum(e, axis=-1, keepdims=True)
        probs = e * pl.reciprocal(denom, approx=True)

        # Fused top-k + combine tensor (static unroll over top_k).
        lane_f = lane_ids.astype(jnp.float32)
        col_ids = jax.lax.broadcasted_iota(jnp.int32, (tile_b, top_k), 1)
        work = probs
        combine = jnp.zeros_like(probs)
        idx_out = jnp.zeros((tile_b, top_k), jnp.int32)
        val_out = jnp.zeros((tile_b, top_k), jnp.float32)
        for kk in range(top_k):
            v = jnp.max(work, axis=-1, keepdims=True)                # [tile_b, 1]
            is_max = work == v
            # First occurrence (lowest lane index) among maxima.
            idx_f = jnp.min(jnp.where(is_max, lane_f, float(e_pad)),
                            axis=-1, keepdims=True)
            idx = idx_f.astype(jnp.int32)                            # [tile_b, 1]
            sel = lane_ids == idx
            combine = combine + jnp.where(sel, probs, 0.0)
            work = jnp.where(sel, -jnp.inf, work)
            idx_out = jnp.where(col_ids == kk, idx, idx_out)
            val_out = jnp.where(col_ids == kk, v, val_out)

        scores_ref[...] = scores
        combine_ref[...] = combine
        idx_ref[...] = idx_out
        topk_ref[...] = val_out


# --------------------------------------------------------------------------- #
# Tiling / VMEM heuristics
# --------------------------------------------------------------------------- #
@functools.lru_cache(maxsize=None)
def _vmem_capacity_bytes():
    try:
        return int(pltpu.get_tpu_info().vmem_capacity_bytes)
    except Exception:
        return 64 << 20        # conservative (v7x per-TC physical VMEM)


def _choose_tiles(B, S, D, itemsize, budget_bytes):
    """Pick (tile_b, tile_s).

    Legality (output-block (8,128) rule on the second-to-last dim):
      * tile_b divides B and is either == B or a multiple of 8,
      * tile_s divides S and is either == S or a multiple of 8.
    Goals: x tile under `budget_bytes` (big tiles amortize ~0.35us/step
    overhead), and >= 2 programs on the parallel B axis when a legal split
    exists (v7x 2-TC megacore; harmless on single-TC v5e/v6e).
    """
    def legal_b(t):
        return t >= 1 and B % t == 0 and (t == B or t % 8 == 0)

    b_cands = [t for t in range(B, 0, -1) if legal_b(t)]       # descending
    min_tile_s = 8 if S % 8 == 0 else S

    fitting = [t for t in b_cands
               if t * min_tile_s * D * itemsize <= budget_bytes]
    tile_b = fitting[0] if fitting else b_cands[-1]

    # Prefer >= 2 programs on the parallel axis when a legal smaller tile exists.
    if B // tile_b == 1:
        smaller = [t for t in b_cands if t < tile_b]
        if smaller:
            tile_b = smaller[0]

    if S % 8 != 0:
        tile_s = S
    else:
        divs = [d for d in range(8, S + 1, 8) if S % d == 0]    # ascending
        s_fit = [d for d in divs if tile_b * d * D * itemsize <= budget_bytes]
        tile_s = s_fit[-1] if s_fit else divs[0]
    return tile_b, tile_s


def _vmem_bytes_estimate(tile_b, tile_s, D, e_pad, top_k, x_item, w_item):
    """What Pallas actually allocates (double-buffered), with acc scratch."""
    x_tile = tile_b * tile_s * D * x_item
    w = (D * e_pad + e_pad) * w_item
    outs = tile_b * (2 * e_pad * 4 + top_k * (4 + 4))
    acc = tile_b * D * 4
    return 2 * x_tile + 2 * w + 2 * outs + acc


# --------------------------------------------------------------------------- #
# Wrapper
# --------------------------------------------------------------------------- #
@functools.partial(jax.jit,
                   static_argnames=("num_experts", "top_k", "tile_b", "tile_s"))
def router_forward(x, w_pad, b_pad, *, num_experts, top_k=2,
                   tile_b=None, tile_s=None):
    """Full router forward: expert scores -> gate -> (combine, indices, topk)."""
    B, S, D = x.shape
    e_pad = w_pad.shape[1]
    assert top_k <= num_experts <= e_pad

    cap = _vmem_capacity_bytes()
    budget = min(16 << 20, cap // 4)              # per-x-tile streaming budget
    auto_b, auto_s = _choose_tiles(B, S, D, x.dtype.itemsize, budget)
    if tile_b is None:
        tile_b = auto_b
    if tile_s is None:
        tile_s = auto_s
    assert B % tile_b == 0 and S % tile_s == 0, "tiles must divide B and S"

    est = _vmem_bytes_estimate(tile_b, tile_s, D, e_pad, top_k,
                               x.dtype.itemsize, w_pad.dtype.itemsize)
    vmem_limit = int(min(cap * 3 // 4, max(est + (8 << 20), 32 << 20)))

    kernel = functools.partial(_router_gate_kernel,
                               num_experts=num_experts, top_k=top_k,
                               inv_seq_len=1.0 / S)

    cost = pl.CostEstimate(
        flops=int(2 * B * D * e_pad + B * S * D),
        transcendentals=int(B * e_pad),
        bytes_accessed=int(B * S * D * x.dtype.itemsize
                           + (D * e_pad + e_pad) * w_pad.dtype.itemsize
                           + B * (2 * e_pad + 2 * top_k) * 4),
    )

    # TODO(synk): single-buffer the constant-index w/b specs via
    # pipeline_mode=pl.Buffered(1) once verified on the target jax build; it
    # only reclaims D*e_pad*dtype bytes of VMEM on v7x.
    scores_pad, combine_pad, indices, topk_gate_scores = pl.pallas_call(
        kernel,
        out_shape=(
            jax.ShapeDtypeStruct((B, e_pad), jnp.float32),   # expert scores
            jax.ShapeDtypeStruct((B, e_pad), jnp.float32),   # combine tensor
            jax.ShapeDtypeStruct((B, top_k), jnp.int32),     # top-k indices
            jax.ShapeDtypeStruct((B, top_k), jnp.float32),   # top-k gate scores
        ),
        grid_spec=pltpu.PrefetchScalarGridSpec(
            num_scalar_prefetch=0,
            grid=(B // tile_b, S // tile_s),
            in_specs=[
                pl.BlockSpec((tile_b, tile_s, D), lambda b, s: (b, s, 0)),
                pl.BlockSpec((D, e_pad), lambda b, s: (0, 0)),
                pl.BlockSpec((1, e_pad), lambda b, s: (0, 0)),
            ],
            out_specs=[
                pl.BlockSpec((tile_b, e_pad), lambda b, s: (b, 0)),
                pl.BlockSpec((tile_b, e_pad), lambda b, s: (b, 0)),
                pl.BlockSpec((tile_b, top_k), lambda b, s: (b, 0)),
                pl.BlockSpec((tile_b, top_k), lambda b, s: (b, 0)),
            ],
            scratch_shapes=[pltpu.VMEM((tile_b, D), jnp.float32)],
        ),
        compiler_params=pltpu.CompilerParams(
            dimension_semantics=("parallel", "arbitrary"),
            vmem_limit_bytes=vmem_limit),
        cost_estimate=cost,
    )(x, w_pad, b_pad)

    # Drop the padded expert lanes (phantom experts can never be selected:
    # their softmax prob is exactly 0 vs strictly positive real experts).
    combine_tensor = combine_pad[:, :num_experts]
    scores = scores_pad[:, :num_experts]
    return combine_tensor, indices, topk_gate_scores, scores


class CachedRouter:
    """Python-level wrapper reproducing the router's caching / tracking semantics."""

    ROUTING_KEY = "routing"

    def __init__(self, w_l3, b_l3, top_k=2, is_tracking=False):
        self.num_experts, _d = w_l3.shape            # PyTorch layout [E, D]
        e_pad = ((self.num_experts + LANE - 1) // LANE) * LANE
        # Hoist transpose + lane padding out of the per-call path (done once).
        # Weights keep their input dtype (bf16 supported; kernel accumulates f32).
        w_t = jnp.transpose(w_l3)                                    # [D, E]
        self.w_pad = jnp.pad(w_t, ((0, 0), (0, e_pad - self.num_experts)))
        self.b_pad = jnp.pad(b_l3, (0, e_pad - self.num_experts)).reshape(1, e_pad)
        self.top_k = top_k
        self.is_tracking = is_tracking
        self.expert_activation = None
        self.state = {}

    def init(self, idx=None, labels=None):
        self.state.clear()

    def forward(self, x):
        if self.ROUTING_KEY in self.state:
            return self.state[self.ROUTING_KEY]
        # TODO(synk): gate.perturbation noise (NORMAL) is omitted — deterministic
        # zero noise is used so the kernel output is reproducible.
        combine_tensor, indices, topk_gate_scores, _scores = router_forward(
            x, self.w_pad, self.b_pad,
            num_experts=self.num_experts, top_k=self.top_k)
        if self.is_tracking:
            # scatter_add over expert indices == bincount via one-hot sum.
            acts = jnp.sum(
                jax.nn.one_hot(indices.reshape(-1), self.num_experts,
                               dtype=jnp.float32), axis=0)
            if self.expert_activation is None:
                self.expert_activation = acts
            else:
                self.expert_activation = self.expert_activation + acts
        result = (combine_tensor, indices, topk_gate_scores)
        self.state[self.ROUTING_KEY] = result
        return result

    def reset_expert_activations(self):
        self.expert_activation = None

    def expert_activations(self):
        return self.expert_activation


if __name__ == "__main__":
    # Small deterministic shapes: batch=2, seq=16, hidden=32, num_experts=8.
    B, S, D, E = 2, 16, 32, 8
    key = jax.random.PRNGKey(0)
    kx, kw, kb = jax.random.split(key, 3)

    x = jax.random.normal(kx, (B, S, D), dtype=jnp.float32)
    w_l3 = jax.random.normal(kw, (E, D), dtype=jnp.float32) * 0.05   # PyTorch [E, D]
    b_l3 = jax.random.normal(kb, (E,), dtype=jnp.float32) * 0.05

    router = CachedRouter(w_l3, b_l3, top_k=2, is_tracking=True)

    combine_tensor, indices, topk_gate_scores = router.forward(x)
    jax.block_until_ready((combine_tensor, indices, topk_gate_scores))

    # Second call exercises the cache path (must return identical objects).
    c2, i2, t2 = router.forward(x)
    assert c2 is combine_tensor and i2 is indices and t2 is topk_gate_scores

    # Direct call with an explicit S tile (exercises the 2-step reduction path)
    # and numerical check against a plain-JAX reference.
    c3, i3, t3, scores = router_forward(
        x, router.w_pad, router.b_pad, num_experts=E, top_k=2, tile_s=8)
    jax.block_until_ready((c3, i3, t3, scores))

    ref_scores = jnp.einsum("bsd,ed->bse", x, w_l3).mean(axis=1) + b_l3
    ref_probs = jax.nn.softmax(ref_scores, axis=-1)
    ref_topk, ref_idx = jax.lax.top_k(ref_probs, 2)
    ref_combine = jnp.sum(
        jax.nn.one_hot(ref_idx, E, dtype=jnp.float32) * ref_topk[..., None], axis=1)

    assert combine_tensor.shape == (B, E)
    assert indices.shape == (B, 2)
    assert topk_gate_scores.shape == (B, 2)
    assert jnp.allclose(scores, ref_scores, atol=1e-4, rtol=1e-4)
    assert jnp.array_equal(i3, ref_idx)
    assert jnp.array_equal(indices, ref_idx)
    assert jnp.allclose(t3, ref_topk, atol=1e-3, rtol=1e-3)
    assert jnp.allclose(topk_gate_scores, ref_topk, atol=1e-3, rtol=1e-3)
    assert jnp.allclose(c3, ref_combine, atol=1e-3, rtol=1e-3)
    assert jnp.allclose(combine_tensor, ref_combine, atol=1e-3, rtol=1e-3)

    # bf16 end-to-end smoke test (activations + weights; f32 accumulation inside).
    cbf, ibf, tbf, sbf = router_forward(
        x.astype(jnp.bfloat16),
        router.w_pad.astype(jnp.bfloat16),
        router.b_pad.astype(jnp.bfloat16),
        num_experts=E, top_k=2)
    jax.block_until_ready((cbf, ibf, tbf, sbf))
    assert cbf.shape == (B, E) and ibf.shape == (B, 2) and tbf.shape == (B, 2)
    assert bool(jnp.all(jnp.isfinite(cbf))) and bool(jnp.all(jnp.isfinite(tbf)))

    print("KERNEL_OK")
</pallas_src>

<mosaic_0001>
module attributes {stable_mosaic.version = 11 : i64} {
  func.func @_router_gate_kernel(%arg0: i32, %arg1: i32, %arg2: memref<2x16x32xf32, #tpu.memory_space<vmem>>, %arg3: memref<32x128xf32, #tpu.memory_space<vmem>>, %arg4: memref<1x128xf32, #tpu.memory_space<vmem>>, %arg5: memref<2x128xf32, #tpu.memory_space<vmem>>, %arg6: memref<2x128xf32, #tpu.memory_space<vmem>>, %arg7: memref<2x2xi32, #tpu.memory_space<vmem>>, %arg8: memref<2x2xf32, #tpu.memory_space<vmem>>, %arg9: memref<2x32xf32, #tpu.memory_space<vmem>>) attributes {dimension_semantics = [#tpu.dimension_semantics<parallel>, #tpu.dimension_semantics<arbitrary>], iteration_bounds = array<i64: 1, 1>, scalar_prefetch = 0 : i64, scratch_operands = 1 : i64, tpu.core_type = #tpu.core_type<tc>, window_params = [{transform_indices = @transform_0, window_bounds = array<i64: 2, 16, 32>}, {pipeline_mode = #tpu.pipeline_mode<synchronous>, transform_indices = @transform_1, window_bounds = array<i64: 32, 128>}, {pipeline_mode = #tpu.pipeline_mode<synchronous>, transform_indices = @transform_2, window_bounds = array<i64: 1, 128>}, {transform_indices = @transform_3, window_bounds = array<i64: 2, 128>}, {transform_indices = @transform_4, window_bounds = array<i64: 2, 128>}, {transform_indices = @transform_5, window_bounds = array<i64: 2, 2>}, {transform_indices = @transform_6, window_bounds = array<i64: 2, 2>}]} {
    %c0_i32 = arith.constant 0 : i32
    %0 = arith.cmpi eq, %arg1, %c0_i32 : i32
    %1 = arith.extui %0 : i1 to i32
    %c0_i32_0 = arith.constant 0 : i32
    %2 = arith.cmpi ne, %1, %c0_i32_0 : i32
    scf.if %2 {
      %cst_9 = arith.constant 0.000000e+00 : f32
      %11 = vector.broadcast %cst_9 : f32 to vector<2x32xf32>
      %c0_10 = arith.constant 0 : index
      %c0_11 = arith.constant 0 : index
      %12 = vector.load %arg9[%c0_10, %c0_11] : memref<2x32xf32, #tpu.memory_space<vmem>>, vector<2x32xf32>
      tpu.vector_store %arg9[%c0_10, %c0_11], %11 {strides = array<i32>} : memref<2x32xf32, #tpu.memory_space<vmem>>, vector<2x32xf32>,
    } else {
    }
    %c0 = arith.constant 0 : index
    %c0_1 = arith.constant 0 : index
    %3 = vector.load %arg9[%c0, %c0_1] : memref<2x32xf32, #tpu.memory_space<vmem>>, vector<2x32xf32>
    %c0_2 = arith.constant 0 : index
    %c0_3 = arith.constant 0 : index
    %c0_4 = arith.constant 0 : index
    %4 = vector.load %arg2[%c0_2, %c0_3, %c0_4] : memref<2x16x32xf32, #tpu.memory_space<vmem>>, vector<2x16x32xf32>
    %cst = arith.constant dense<0.000000e+00> : vector<2x32xf32>
    %5 = vector.multi_reduction <add>, %4, %cst [1] : vector<2x16x32xf32> to vector<2x32xf32>
    %6 = arith.addf %3, %5 : vector<2x32xf32>
    %c0_5 = arith.constant 0 : index
    %c0_6 = arith.constant 0 : index
    %7 = vector.load %arg9[%c0_5, %c0_6] : memref<2x32xf32, #tpu.memory_space<vmem>>, vector<2x32xf32>
    tpu.vector_store %arg9[%c0_5, %c0_6], %6 {strides = array<i32>} : memref<2x32xf32, #tpu.memory_space<vmem>>, vector<2x32xf32>,
    %c0_i32_7 = arith.constant 0 : i32
    %8 = arith.cmpi eq, %arg1, %c0_i32_7 : i32
    %9 = arith.extui %8 : i1 to i32
    %c0_i32_8 = arith.constant 0 : i32
    %10 = arith.cmpi ne, %9, %c0_i32_8 : i32
    scf.if %10 {
      %c0_9 = arith.constant 0 : index
      %c0_10 = arith.constant 0 : index
      %11 = vector.load %arg9[%c0_9, %c0_10] : memref<2x32xf32, #tpu.memory_space<vmem>>, vector<2x32xf32>
      %cst_11 = arith.constant 6.250000e-02 : f32
      %12 = vector.broadcast %cst_11 : f32 to vector<2x32xf32>
      %13 = arith.mulf %11, %12 : vector<2x32xf32>
      %c0_12 = arith.constant 0 : index
      %c0_13 = arith.constant 0 : index
      %14 = vector.load %arg3[%c0_12, %c0_13] : memref<32x128xf32, #tpu.memory_space<vmem>>, vector<32x128xf32>
      %c0_14 = arith.constant 0 : index
      %c0_15 = arith.constant 0 : index
      %15 = vector.load %arg4[%c0_14, %c0_15] : memref<1x128xf32, #tpu.memory_space<vmem>>, vector<1x128xf32>
      %cst_16 = arith.constant dense<0.000000e+00> : vector<2x128xf32>
      %16 = tpu.matmul %13, %14, %cst_16 {dimension_numbers = #tpu.dot_dimension_numbers<[1], [0], [0], [1], [0, 0, 1, 1], [], []>} : vector<2x32xf32>, vector<32x128xf32>, vector<2x128xf32> -> vector<2x128xf32>
      %17 = vector.broadcast %15 : vector<1x128xf32> to vector<2x128xf32>
      %18 = arith.addf %16, %17 : vector<2x128xf32>
      %19 = tpu.iota {dimensions = array<i32: 1>} : vector<2x128xi32>
      %c8_i32 = arith.constant 8 : i32
      %20 = vector.broadcast %c8_i32 : i32 to vector<2x128xi32>
      %21 = arith.cmpi slt, %19, %20 : vector<2x128xi32>
      %cst_17 = arith.constant 0xFF800000 : f32
      %22 = vector.broadcast %cst_17 : f32 to vector<2x128xf32>
      %23 = arith.select %21, %18, %22 : vector<2x128xi1>, vector<2x128xf32>
      %cst_18 = arith.constant dense<0xFF800000> : vector<2xf32>
      %24 = vector.multi_reduction <maximumf>, %23, %cst_18 [1] : vector<2x128xf32> to vector<2xf32>
      %25 = vector.shape_cast %24 : vector<2xf32> to vector<2x1xf32>
      %26 = vector.broadcast %25 : vector<2x1xf32> to vector<2x128xf32>
      %27 = arith.subf %23, %26 : vector<2x128xf32>
      %28 = math.exp %27 : vector<2x128xf32>
      %cst_19 = arith.constant 0.000000e+00 : f32
      %29 = vector.broadcast %cst_19 : f32 to vector<2x128xf32>
      %30 = arith.select %21, %28, %29 : vector<2x128xi1>, vector<2x128xf32>
      %cst_20 = arith.constant dense<0.000000e+00> : vector<2xf32>
      %31 = vector.multi_reduction <add>, %30, %cst_20 [1] : vector<2x128xf32> to vector<2xf32>
      %32 = vector.shape_cast %31 : vector<2xf32> to vector<2x1xf32>
      %33 = tpu.reciprocal %32 {approx = true} : vector<2x1xf32> -> vector<2x1xf32>
      %34 = vector.broadcast %33 : vector<2x1xf32> to vector<2x128xf32>
      %35 = arith.mulf %30, %34 : vector<2x128xf32>
      %36 = arith.sitofp %19 : vector<2x128xi32> to vector<2x128xf32>
      %37 = tpu.iota {dimensions = array<i32: 1>} : vector<2x2xi32>
      %cst_21 = arith.constant 0.000000e+00 : f32
      %38 = vector.broadcast %cst_21 : f32 to vector<2x128xf32>
      %c0_i32_22 = arith.constant 0 : i32
      %39 = vector.broadcast %c0_i32_22 : i32 to vector<2x2xi32>
      %cst_23 = arith.constant 0.000000e+00 : f32
      %40 = vector.broadcast %cst_23 : f32 to vector<2x2xf32>
      %cst_24 = arith.constant dense<0xFF800000> : vector<2xf32>
      %41 = vector.multi_reduction <maximumf>, %35, %cst_24 [1] : vector<2x128xf32> to vector<2xf32>
      %42 = vector.shape_cast %41 : vector<2xf32> to vector<2x1xf32>
      %43 = vector.broadcast %42 : vector<2x1xf32> to vector<2x128xf32>
      %44 = arith.cmpf oeq, %35, %43 : vector<2x128xf32>
      %cst_25 = arith.constant 1.280000e+02 : f32
      %45 = vector.broadcast %cst_25 : f32 to vector<2x128xf32>
      %46 = arith.select %44, %36, %45 : vector<2x128xi1>, vector<2x128xf32>
      %cst_26 = arith.constant dense<0x7F800000> : vector<2xf32>
      %47 = vector.multi_reduction <minimumf>, %46, %cst_26 [1] : vector<2x128xf32> to vector<2xf32>
      %48 = vector.shape_cast %47 : vector<2xf32> to vector<2x1xf32>
      %49 = arith.fptosi %48 : vector<2x1xf32> to vector<2x1xi32>
      %50 = vector.broadcast %49 : vector<2x1xi32> to vector<2x128xi32>
      %51 = arith.cmpi eq, %19, %50 : vector<2x128xi32>
      %cst_27 = arith.constant 0.000000e+00 : f32
      %52 = vector.broadcast %cst_27 : f32 to vector<2x128xf32>
      %53 = arith.select %51, %35, %52 : vector<2x128xi1>, vector<2x128xf32>
      %54 = arith.addf %38, %53 : vector<2x128xf32>
      %cst_28 = arith.constant 0xFF800000 : f32
      %55 = vector.broadcast %cst_28 : f32 to vector<2x128xf32>
      %56 = arith.select %51, %55, %35 : vector<2x128xi1>, vector<2x128xf32>
      %c0_i32_29 = arith.constant 0 : i32
      %57 = vector.broadcast %c0_i32_29 : i32 to vector<2x2xi32>
      %58 = arith.cmpi eq, %37, %57 : vector<2x2xi32>
      %59 = vector.shape_cast %49 : vector<2x1xi32> to vector<2x1xi32>
      %60 = vector.broadcast %59 : vector<2x1xi32> to vector<2x2xi32>
      %61 = arith.select %58, %60, %39 : vector<2x2xi1>, vector<2x2xi32>
      %c0_i32_30 = arith.constant 0 : i32
      %62 = vector.broadcast %c0_i32_30 : i32 to vector<2x2xi32>
      %63 = arith.cmpi eq, %37, %62 : vector<2x2xi32>
      %64 = vector.shape_cast %42 : vector<2x1xf32> to vector<2x1xf32>
      %65 = vector.broadcast %64 : vector<2x1xf32> to vector<2x2xf32>
      %66 = arith.select %63, %65, %40 : vector<2x2xi1>, vector<2x2xf32>
      %cst_31 = arith.constant dense<0xFF800000> : vector<2xf32>
      %67 = vector.multi_reduction <maximumf>, %56, %cst_31 [1] : vector<2x128xf32> to vector<2xf32>
      %68 = vector.shape_cast %67 : vector<2xf32> to vector<2x1xf32>
      %69 = vector.broadcast %68 : vector<2x1xf32> to vector<2x128xf32>
      %70 = arith.cmpf oeq, %56, %69 : vector<2x128xf32>
      %cst_32 = arith.constant 1.280000e+02 : f32
      %71 = vector.broadcast %cst_32 : f32 to vector<2x128xf32>
      %72 = arith.select %70, %36, %71 : vector<2x128xi1>, vector<2x128xf32>
      %cst_33 = arith.constant dense<0x7F800000> : vector<2xf32>
      %73 = vector.multi_reduction <minimumf>, %72, %cst_33 [1] : vector<2x128xf32> to vector<2xf32>
      %74 = vector.shape_cast %73 : vector<2xf32> to vector<2x1xf32>
      %75 = arith.fptosi %74 : vector<2x1xf32> to vector<2x1xi32>
      %76 = vector.broadcast %75 : vector<2x1xi32> to vector<2x128xi32>
      %77 = arith.cmpi eq, %19, %76 : vector<2x128xi32>
      %cst_34 = arith.constant 0.000000e+00 : f32
      %78 = vector.broadcast %cst_34 : f32 to vector<2x128xf32>
      %79 = arith.select %77, %35, %78 : vector<2x128xi1>, vector<2x128xf32>
      %80 = arith.addf %54, %79 : vector<2x128xf32>
      %c1_i32 = arith.constant 1 : i32
      %81 = vector.broadcast %c1_i32 : i32 to vector<2x2xi32>
      %82 = arith.cmpi eq, %37, %81 : vector<2x2xi32>
      %83 = vector.shape_cast %75 : vector<2x1xi32> to vector<2x1xi32>
      %84 = vector.broadcast %83 : vector<2x1xi32> to vector<2x2xi32>
      %85 = arith.select %82, %84, %61 : vector<2x2xi1>, vector<2x2xi32>
      %c1_i32_35 = arith.constant 1 : i32
      %86 = vector.broadcast %c1_i32_35 : i32 to vector<2x2xi32>
      %87 = arith.cmpi eq, %37, %86 : vector<2x2xi32>
      %88 = vector.shape_cast %68 : vector<2x1xf32> to vector<2x1xf32>
      %89 = vector.broadcast %88 : vector<2x1xf32> to vector<2x2xf32>
      %90 = arith.select %87, %89, %66 : vector<2x2xi1>, vector<2x2xf32>
      %c0_36 = arith.constant 0 : index
      %c0_37 = arith.constant 0 : index
      %91 = vector.load %arg5[%c0_36, %c0_37] : memref<2x128xf32, #tpu.memory_space<vmem>>, vector<2x128xf32>
      tpu.vector_store %arg5[%c0_36, %c0_37], %23 {strides = array<i32>} : memref<2x128xf32, #tpu.memory_space<vmem>>, vector<2x128xf32>,
      %c0_38 = arith.constant 0 : index
      %c0_39 = arith.constant 0 : index
      %92 = vector.load %arg6[%c0_38, %c0_39] : memref<2x128xf32, #tpu.memory_space<vmem>>, vector<2x128xf32>
      tpu.vector_store %arg6[%c0_38, %c0_39], %80 {strides = array<i32>} : memref<2x128xf32, #tpu.memory_space<vmem>>, vector<2x128xf32>,
      %c0_40 = arith.constant 0 : index
      %c0_41 = arith.constant 0 : index
      %93 = vector.load %arg7[%c0_40, %c0_41] : memref<2x2xi32, #tpu.memory_space<vmem>>, vector<2x2xi32>
      tpu.vector_store %arg7[%c0_40, %c0_41], %85 {strides = array<i32>} : memref<2x2xi32, #tpu.memory_space<vmem>>, vector<2x2xi32>,
      %c0_42 = arith.constant 0 : index
      %c0_43 = arith.constant 0 : index
      %94 = vector.load %arg8[%c0_42, %c0_43] : memref<2x2xf32, #tpu.memory_space<vmem>>, vector<2x2xf32>
      tpu.vector_store %arg8[%c0_42, %c0_43], %90 {strides = array<i32>} : memref<2x2xf32, #tpu.memory_space<vmem>>, vector<2x2xf32>,
    } else {
    }
    return
  }
  func.func @transform_0(%arg0: i32, %arg1: i32) -> (i32, i32, i32) {
    %c0_i32 = arith.constant 0 : i32
    %c0_i32_0 = arith.constant 0 : i32
    return %arg0, %arg1, %c0_i32 : i32, i32, i32
  }
  func.func @transform_1(%arg0: i32, %arg1: i32) -> (i32, i32) {
    %c0_i32 = arith.constant 0 : i32
    %c0_i32_0 = arith.constant 0 : i32
    %c0_i32_1 = arith.constant 0 : i32
    return %c0_i32, %c0_i32_0 : i32, i32
  }
  func.func @transform_2(%arg0: i32, %arg1: i32) -> (i32, i32) {
    %c0_i32 = arith.constant 0 : i32
    %c0_i32_0 = arith.constant 0 : i32
    %c0_i32_1 = arith.constant 0 : i32
    return %c0_i32, %c0_i32_0 : i32, i32
  }
  func.func @transform_3(%arg0: i32, %arg1: i32) -> (i32, i32) {
    %c0_i32 = arith.constant 0 : i32
    %c0_i32_0 = arith.constant 0 : i32
    return %arg0, %c0_i32 : i32, i32
  }
  func.func @transform_4(%arg0: i32, %arg1: i32) -> (i32, i32) {
    %c0_i32 = arith.constant 0 : i32
    %c0_i32_0 = arith.constant 0 : i32
    return %arg0, %c0_i32 : i32, i32
  }
  func.func @transform_5(%arg0: i32, %arg1: i32) -> (i32, i32) {
    %c0_i32 = arith.constant 0 : i32
    %c0_i32_0 = arith.constant 0 : i32
    return %arg0, %c0_i32 : i32, i32
  }
  func.func @transform_6(%arg0: i32, %arg1: i32) -> (i32, i32) {
    %c0_i32 = arith.constant 0 : i32
    %c0_i32_0 = arith.constant 0 : i32
    return %arg0, %c0_i32 : i32, i32
  }
}

</mosaic_0001>

<bundles_post_ra>
// kernel: router_forward.1
= control target key start
LH: loop header
LB: loop body
LE: loop exit
PB: predicated region body
PF: predicated region fallthrough
CT: control target
= control target key end

     0   :  { %12 = vsyncpa [#allocation4], 0  ;;  %s635_s0 = inlined_call_operand.hbm [shape: f32[2,16,32], index: 0, kind: input, shape index: {}]   ;;  %s636_s1 = inlined_call_operand.hbm [shape: f32[32,128], index: 1, kind: input, shape index: {}]   ;;  %s637_s2 = inlined_call_operand.vmem [shape: f32[1,128], index: 2, kind: input, shape index: {}]   ;;  %s638_s3 = inlined_call_operand.hbm [shape: f32[2,128], index: 3, kind: output, shape index: {0}]   ;;  %s639_s4 = inlined_call_operand.hbm [shape: f32[2,128], index: 4, kind: output, shape index: {1}]   ;;  %s640_s5 = inlined_call_operand.hbm [shape: s32[2,2], index: 5, kind: output, shape index: {2}]   ;;  %s641_s6 = inlined_call_operand.hbm [shape: f32[2,2], index: 6, kind: output, shape index: {3}]  }
   0x1   :  { %13 = vsyncpa [#allocation7], 0 }
   0x2   :  { %14 = vsyncpa [#allocation5], 0 }
   0x3   :  { %15 = vsyncpa [#allocation10], 0 }
   0x4   :  { %16 = vsyncpa [#allocation13], 0  ;;  %s472_s21 = smov [#allocation3]   ;;  %s330_s25 = scalar_lea.hbm %s635_s0, 512 }
   0x5   :  { %s22_s22 = sshll.u32 %s472_s21, 4  ;;  %p331_p0 = scmp.ne.s32.totalorder %s635_s0, %s330_s25  ;;  %s23_s22 = int_to_ptr.vmem [resolvable:$true] %s22_s22 }
   0x6   :  { %p334_p1 = scmp.lt.u32.totalorder %s330_s25, %s635_s0 }
   0x8   :  { %p336_p2 = pnand %p334_p1, %p331_p0 }
   0xa   :  { %339 = shalt.err (!%p336_p2)
}
   0xb   :  { %s340_s30 = scalar_lea.vmem %s23_s22, 512  ;;  %p345_p4 = scmp.lt.s32.totalorder %s23_s22, %s23_s22 }
   0xc   :  { %p341_p3 = scmp.ne.s32.totalorder %s23_s22, %s340_s30  ;;  %p346_p5 = scmp.lt.s32.totalorder %s340_s30, %s340_s30 }
   0xe   :  { %p347_p6 = por %p346_p5, %p345_p4 }
  0x10   :  { %p348_p7 = pnand %p347_p6, %p341_p3 }
  0x12   :  { %351 = shalt.err (!%p348_p7)
}
  0x13   :  { %s473_s7 = smov 128   ;;  %s474_s8 = smov 8  }
  0x14   :  { %28 = dma.hbm_to_vmem [thread:$0]  %s635_s0, 512, %s23_s22, [#allocation4], %s473_s7, %s473_s7, %s474_s8  }
  0x15   :  { %s475_s11 = smov [#allocation6]   ;;  %s352_s15 = scalar_lea.hbm %s636_s1, 512 }
  0x16   :  { %s34_s12 = sshll.u32 %s475_s11, 4  ;;  %p353_p8 = scmp.ne.s32.totalorder %s636_s1, %s352_s15  ;;  %s35_s12 = int_to_ptr.vmem [resolvable:$true] %s34_s12 }
  0x17   :  { %p356_p9 = scmp.lt.u32.totalorder %s352_s15, %s636_s1 }
  0x19   :  { %p358_p10 = pnand %p356_p9, %p353_p8 }
  0x1b   :  { %361 = shalt.err (!%p358_p10)
}
  0x1c   :  { %s362_s20 = scalar_lea.vmem %s35_s12, 512  ;;  %p367_p12 = scmp.lt.s32.totalorder %s35_s12, %s35_s12 }
  0x1d   :  { %p363_p11 = scmp.ne.s32.totalorder %s35_s12, %s362_s20  ;;  %p368_p13 = scmp.lt.s32.totalorder %s362_s20, %s362_s20 }
  0x1f   :  { %p369_p0 = por %p368_p13, %p367_p12 }
  0x21   :  { %p370_p1 = pnand %p369_p0, %p363_p11 }
  0x23   :  { %373 = shalt.err (!%p370_p1)
}
  0x24   :  { %40 = dma.hbm_to_vmem [thread:$0]  %s636_s1, 512, %s35_s12, [#allocation7], %s473_s7, %s473_s7, %s474_s8  }
  0x25   :  { %462 = dma.done.wait [#allocation4], 512  }
  0x26   :  { %463 = vsyncadd [#allocation4], 4294966784 }
  0x27   :  { %464 = dma.done.wait [#allocation7], 512  }
  0x28   :  { %465 = vsyncadd [#allocation7], 4294966784  ;;  %vm53_vm0 = vcmask 254976   ;;  %v476_v0 = vmov 0.0|0.0   ;;  %v477_v1 = vmov 0.0   ;;  %vm478_vm1 = vmmov 0  }
  0x29   :  { %305 = vmatprep.subr.bf16.mxu0 %v476_v0  ;;  %54 = vst.msk [vmem:[#allocation2] sm:$0x3] %vm53_vm0, %v477_v1  ;;  %302 = vmatprep.mubr.msk.f32.mxu0 %vm478_vm1, %v477_v1  ;;  %vm60_vm2 = vcmask 261120   ;;  %v92_v2 = vld [vmem:[#allocation6] sm:$0xff]  ;;  %v93_v3 = vld [vmem:[#allocation6 + $0x8] sm:$0xff]  ;;  %v94_v4 = vld [vmem:[#allocation6 + $0x10] sm:$0xff]  ;;  %v176_v35 = vlaneseq }
  0x2a   :  { %v306_v5 = vpack.c.bf16 %v93_v3, %v92_v2  ;;  %v95_v6 = vld [vmem:[#allocation6 + $0x18] sm:$0xff]  ;;  %v56_v7 = vld [vmem:[#allocation3] sm:$0xff]  ;;  %v57_v8 = vld [vmem:[#allocation3 + $0x8] sm:$0xff]  ;;  %vm81_vm3 = vcmask 1041409   ;;  %vm180_vm5 = vcmask 1041408   ;;  %vm227_vm10 = vcmask 9216  }
  0x2b   :  { %v58_v9 = vld [vmem:[#allocation3 + $0x10] sm:$0xff]  ;;  %v59_v10 = vld [vmem:[#allocation3 + $0x18] sm:$0xff]  ;;  %v61_v11 = vsel %vm60_vm2, %v56_v7, 0.0  ;;  %v309_v12 = vpack.c.bf16 %v95_v6, %v94_v4  ;;  %v62_v13 = vsel %vm60_vm2, %v57_v8, 0.0  ;;  %v549_v36 = vand.u32 127, %v176_v35 }
  0x2c   :  { %307 = vmatpush3.bf16.msra.mxu0 %v306_v5  ;;  %v70_v14 = vsel %vm60_vm2, %v58_v9, 0.0  ;;  %v71_v15 = vsel %vm60_vm2, %v59_v10, 0.0  ;;  %v63_v16 = vadd.f32 %v62_v13, %v61_v11  ;;  %v287_v37 = vld [vmem:[%s637_s2] ss:$0 sm:$0xff]  ;;  %s479_s2 = smov [#allocation8]  }
  0x2d   :  { %308 = vmatprep.subr.bf16.mxu0 %v476_v0  ;;  %v72_v17 = vadd.f32 %v71_v15, %v70_v14  ;;  %vm178_vm4 = vcmp.lt.s32.totalorder %v549_v36, 8  ;;  %v193_v53 = vcvt.s32.f32 %v549_v36  ;;  %vm207_vm8 = vcmp.eq.s32.totalorder %v549_v36, 0  ;;  %s236_s23 = sshll.u32 %s479_s2, 4  ;;  %s237_s23 = int_to_ptr.vmem [resolvable:$true] %s236_s23 }
  0x2e   :  { %v64_v18 = vrot.slane %v63_v16, 4  ;;  %vm222_vm9 = vcmp.eq.s32.totalorder %v549_v36, 1  ;;  %s374_s24 = scalar_lea.vmem %s237_s23, 32  ;;  %p379_p3 = scmp.lt.s32.totalorder %s237_s23, %s237_s23 }
  0x2f   :  { %v73_v19 = vrot.slane %v72_v17, 4  ;;  %p375_p2 = scmp.ne.s32.totalorder %s237_s23, %s374_s24  ;;  %p380_p4 = scmp.lt.s32.totalorder %s374_s24, %s374_s24 }
  0x30   :  { %310 = vmatpush3.bf16.msra.mxu0 %v309_v12  ;;  %v65_v20 = vadd.f32 %v64_v18, %v63_v16  ;;  %v55_v28 = vld [vmem:[#allocation2] sm:$0x3] }
  0x31   :  { %v74_v21 = vadd.f32 %v73_v19, %v72_v17  ;;  %p381_p5 = por %p380_p4, %p379_p3 }
  0x32   :  { %v66_v22 = vrot.slane %v65_v20, 2 }
  0x33   :  { %v75_v23 = vrot.slane %v74_v21, 2  ;;  %p382_p6 = pnand %p381_p5, %p375_p2 }
  0x34   :  { %v67_v24 = vadd.f32 %v66_v22, %v65_v20 }
  0x35   :  { %v76_v25 = vadd.f32 %v75_v23, %v74_v21 }
  0x36   :  { %v68_v26 = vrot.slane %v67_v24, 1 }
  0x37   :  { %v77_v27 = vrot.slane %v76_v25, 1 }
  0x38   :  { %v69_v29 = vadd.f32 %v68_v26, %v67_v24 }
  0x39   :  { %v78_v30 = vadd.f32 %v77_v27, %v76_v25 }
  0x3b   :  { %v82_v31 = vsel %vm81_vm3, %v78_v30, %v69_v29 }
  0x3c   :  { %v84_v32 = vadd.f32 %v82_v31, %v55_v28 }
  0x3e   :  { %86 = vst.msk [vmem:[#allocation2] sm:$0x3] %vm53_vm0, %v84_v32 }
  0x45   :  { %v90_v33 = vld [vmem:[#allocation2] sm:$0x3] }
  0x46   :  { %v91_v34 = vmul.f32 0.0625, %v90_v33 }
  0x48   :  { %303 = vmatmul.mubr.msk.f32.vlgmr.msra.gmra.mrb[0].mxu0 %vm60_vm2, %v91_v34 }
 0x11b   :  { %v172_v38 = vpop.f32.mrb[0].mxu0 }
 0x11c   :  { %v173_v39 = vadd.f32 %v287_v37, %v172_v38  ;;  %v304_v40 = vpop.f32.mrb[1].mxu0 }
 0x11e   :  { %v179_v41 = vsel %vm178_vm4, %v173_v39, -inf }
 0x11f   :  { %v181_v42 = vsel %vm180_vm5, %v179_v41, -inf  ;;  %225 = vst [vmem:[#allocation8] sm:$0x3] %v179_v41 }
 0x120   :  { %182 = vmax.xlane.f32.xlu0 %v181_v42 }
 0x1ad   :  { %v183_v43 = vpop.xlane.xlu0 %182 }
 0x1ae   :  { %v184_v44 = vsub.f32 %v179_v41, %v183_v43 }
 0x1b0   :  { %v185_v45 = vmul.f32 1.442695, %v184_v44 }
 0x1b2   :  { %326 = vpow2.f32 %v185_v45 }
 0x1bc   :  { %v327_v46 = vpop.eup %326 }
 0x1bd   :  { %v187_v47 = vsel %vm178_vm4, %v327_v46, 0.0 }
 0x1be   :  { %v188_v48 = vsel %vm180_vm5, %v187_v47, 0.0 }
 0x1bf   :  { %189 = vadd.xlane.f32.xlu0 %v188_v48 }
 0x24c   :  { %v190_v49 = vpop.xlane.xlu0 %189 }
 0x24d   :  { %328 = vrcp.f32 %v190_v49 }
 0x257   :  { %v329_v50 = vpop.eup %328 }
 0x258   :  { %v557_v51 = vmul.f32 %v329_v50, %v187_v47 }
 0x25a   :  { %v194_v52 = vsel %vm180_vm5, %v557_v51, -inf }
 0x25b   :  { %195 = vmax.xlane.f32.xlu1 %v194_v52 }
 0x2e8   :  { %v196_v54 = vpop.xlane.xlu1 %195 }
 0x2e9   :  { %vm197_vm6 = vcmp.eq.f32.partialorder %v557_v51, %v196_v54  ;;  %v209_v62 = vsel %vm207_vm8, %v196_v54, 0.0 }
 0x2ea   :  { %v198_v55 = vsel %vm197_vm6, %v193_v53, 128.0 }
 0x2eb   :  { %v199_v56 = vsel %vm180_vm5, %v198_v55, inf }
 0x2ec   :  { %200 = vmin.xlane.f32.xlu1 %v199_v56 }
 0x379   :  { %v201_v57 = vpop.xlane.xlu1 %200 }
 0x37a   :  { %v311_v58 = vtrunc.f32 %v201_v57 }
 0x37c   :  { %v312_v59 = vcvt.f32.s32 %v311_v58 }
 0x37e   :  { %vm203_vm7 = vcmp.eq.s32.totalorder %v549_v36, %v312_v59 }
 0x37f   :  { %v206_v60 = vsel %vm203_vm7, -inf, %v557_v51 }
 0x380   :  { %v210_v61 = vsel %vm180_vm5, %v206_v60, -inf }
 0x381   :  { %211 = vmax.xlane.f32.xlu0 %v210_v61 }
 0x40e   :  { %v212_v63 = vpop.xlane.xlu0 %211 }
 0x40f   :  { %vm213_vm11 = vcmp.eq.f32.partialorder %v206_v60, %v212_v63  ;;  %v224_v0 = vsel %vm222_vm9, %v212_v63, %v209_v62 }
 0x410   :  { %v214_v1 = vsel %vm213_vm11, %v193_v53, 128.0  ;;  %229 = vst.msk [vmem:[#allocation12] sm:$0x3] %vm227_vm10, %v224_v0 }
 0x411   :  { %v215_v2 = vsel %vm180_vm5, %v214_v1, inf }
 0x412   :  { %216 = vmin.xlane.f32.xlu1 %v215_v2 }
 0x413   :  { %385 = shalt.err (!%p382_p6)
}
 0x414   :  { %s386_s27 = scalar_lea.hbm %s638_s3, 32 }
 0x415   :  { %p387_p7 = scmp.ne.s32.totalorder %s638_s3, %s386_s27  ;;  %p390_p8 = scmp.lt.u32.totalorder %s386_s27, %s638_s3 }
 0x417   :  { %p392_p9 = pnand %p390_p8, %p387_p7 }
 0x419   :  { %395 = shalt.err (!%p392_p9)
}
 0x41a   :  { %239 = dma.vmem_to_hbm [thread:$0]  %s237_s23, 32, %s638_s3, [#allocation5]  }
 0x41b   :  { %s480_s10 = smov [#allocation12]  }
 0x41c   :  { %s266_s11 = sshll.u32 %s480_s10, 4  ;;  %s267_s11 = int_to_ptr.vmem [resolvable:$true] %s266_s11 }
 0x41d   :  { %s396_s12 = scalar_lea.vmem %s267_s11, 32  ;;  %p401_p11 = scmp.lt.s32.totalorder %s267_s11, %s267_s11 }
 0x41e   :  { %p397_p10 = scmp.ne.s32.totalorder %s267_s11, %s396_s12  ;;  %p402_p12 = scmp.lt.s32.totalorder %s396_s12, %s396_s12 }
 0x420   :  { %p403_p13 = por %p402_p12, %p401_p11 }
 0x422   :  { %p404_p0 = pnand %p403_p13, %p397_p10 }
 0x424   :  { %407 = shalt.err (!%p404_p0)
}
 0x425   :  { %s408_s15 = scalar_lea.hbm %s641_s6, 32 }
 0x426   :  { %p409_p1 = scmp.ne.s32.totalorder %s641_s6, %s408_s15  ;;  %p412_p2 = scmp.lt.u32.totalorder %s408_s15, %s641_s6 }
 0x428   :  { %p414_p3 = pnand %p412_p2, %p409_p1 }
 0x42a   :  { %417 = shalt.err (!%p414_p3)
}
 0x42b   :  { %269 = dma.vmem_to_hbm [thread:$0]  %s267_s11, 32, %s641_s6, [#allocation13]   ;;  %v208_v6 = vsel %vm207_vm8, %v312_v59, 0  ;;  %v204_v8 = vsel %vm203_vm7, %v557_v51, 0.0 }
 0x42c   :  { %s481_s0 = smov [#allocation9]   ;;  %s482_s1 = smov [#allocation11]  }
 0x42d   :  { %s246_s21 = sshll.u32 %s481_s0, 4  ;;  %s256_s22 = sshll.u32 %s482_s1, 4  ;;  %s247_s21 = int_to_ptr.vmem [resolvable:$true] %s246_s21  ;;  %s257_s22 = int_to_ptr.vmem [resolvable:$true] %s256_s22 }
 0x42e   :  { %s418_s6 = scalar_lea.vmem %s247_s21, 32  ;;  %p423_p5 = scmp.lt.s32.totalorder %s247_s21, %s247_s21 }
 0x42f   :  { %p419_p4 = scmp.ne.s32.totalorder %s247_s21, %s418_s6  ;;  %p424_p6 = scmp.lt.s32.totalorder %s418_s6, %s418_s6 }
 0x431   :  { %p425_p7 = por %p424_p6, %p423_p5 }
 0x433   :  { %p426_p8 = pnand %p425_p7, %p419_p4 }
 0x49f   :  { %v217_v3 = vpop.xlane.xlu1 %216 }
 0x4a0   :  { %v313_v4 = vtrunc.f32 %v217_v3 }
 0x4a2   :  { %v314_v5 = vcvt.f32.s32 %v313_v4 }
 0x4a4   :  { %vm219_vm12 = vcmp.eq.s32.totalorder %v549_v36, %v314_v5  ;;  %v223_v7 = vsel %vm222_vm9, %v314_v5, %v208_v6 }
 0x4a5   :  { %v220_v9 = vsel %vm219_vm12, %v557_v51, 0.0  ;;  %228 = vst.msk [vmem:[#allocation11] sm:$0x3] %vm227_vm10, %v223_v7 }
 0x4a6   :  { %v221_v10 = vadd.f32 %v220_v9, %v204_v8 }
 0x4a8   :  { %226 = vst [vmem:[#allocation9] sm:$0x3] %v221_v10 }
 0x4a9   :  { %429 = shalt.err (!%p426_p8)
}
 0x4aa   :  { %s430_s24 = scalar_lea.hbm %s639_s4, 32 }
 0x4ab   :  { %p431_p9 = scmp.ne.s32.totalorder %s639_s4, %s430_s24  ;;  %p434_p10 = scmp.lt.u32.totalorder %s430_s24, %s639_s4 }
 0x4ad   :  { %p436_p11 = pnand %p434_p10, %p431_p9 }
 0x4af   :  { %439 = shalt.err (!%p436_p11)
}
 0x4b0   :  { %249 = dma.vmem_to_hbm [thread:$0]  %s247_s21, 32, %s639_s4, [#allocation10]  }
 0x4b1   :  { %s440_s7 = scalar_lea.vmem %s257_s22, 32  ;;  %p445_p13 = scmp.lt.s32.totalorder %s257_s22, %s257_s22 }
 0x4b2   :  { %p441_p12 = scmp.ne.s32.totalorder %s257_s22, %s440_s7  ;;  %p446_p0 = scmp.lt.s32.totalorder %s440_s7, %s440_s7 }
 0x4b4   :  { %p447_p1 = por %p446_p0, %p445_p13 }
 0x4b6   :  { %p448_p2 = pnand %p447_p1, %p441_p12 }
 0x4b8   :  { %451 = shalt.err (!%p448_p2)
}
 0x4b9   :  { %s452_s10 = scalar_lea.hbm %s640_s5, 32 }
 0x4ba   :  { %p453_p3 = scmp.ne.s32.totalorder %s640_s5, %s452_s10  ;;  %p456_p4 = scmp.lt.u32.totalorder %s452_s10, %s640_s5 }
 0x4bc   :  { %p458_p5 = pnand %p456_p4, %p453_p3 }
 0x4be   :  { %461 = shalt.err (!%p458_p5)
}
 0x4bf   :  { %259 = dma.vmem_to_hbm [thread:$0]  %s257_s22, 32, %s640_s5, [#allocation10]  }
 0x4c0   :  { %466 = dma.done.wait [#allocation5], 32  }
 0x4c1   :  { %467 = vsyncadd [#allocation5], 4294967264 }
 0x4c2   :  { %468 = dma.done.wait [#allocation10], 64  }
 0x4c3   :  { %469 = vsyncadd [#allocation10], 4294967232 }
 0x4c4   :  { %470 = dma.done.wait [#allocation13], 32  }
 0x4c5   :  { %471 = vsyncadd [#allocation13], 4294967264 }
 0x4c6   :  { %282 = vsyncpa [#allocation4], 1 }
 0x4c7   :  { %283 = vsyncpa [#allocation7], 1 }
 0x4c8   :  { %284 = vsyncpa [#allocation5], 1 }
 0x4c9   :  { %285 = vsyncpa [#allocation10], 1 }
 0x4ca   :  { %286 = vsyncpa [#allocation13], 1 }

</bundles_post_ra>
